<compile_context>
chip_gen: v6e
topology: v6e:2x2x1
jax: 0.10.0
libtpu: 0.0.40
codegen_flags: <defaults>
</compile_context>

<pallas_src>
import jax
import jax.numpy as jnp
from jax.experimental import pallas as pl
from jax.experimental.pallas import tpu as pltpu


def _identity_dma_kernel(x_hbm_ref, o_hbm_ref, sem):
    # Single HBM -> HBM DMA covering the whole array.  Zero compute; the DMA
    # engine streams read and write concurrently, so wall time ~= max(read,
    # write) at the HBM roofline on v5e / v6e / v7x alike.
    cp = pltpu.make_async_copy(x_hbm_ref, o_hbm_ref, sem)
    cp.start()
    cp.wait()


def _identity_copy_pallas(x: jax.Array) -> jax.Array:
    """Copies `x` into a fresh buffer via a single HBM->HBM DMA.

    Works for any shape and dtype (no lane/sublane divisibility requirement,
    no reshape, no padding) because both refs stay in HBM and share a layout.
    """
    n_bytes = x.size * jnp.dtype(x.dtype).itemsize
    return pl.pallas_call(
        _identity_dma_kernel,
        out_shape=jax.ShapeDtypeStruct(x.shape, x.dtype),
        in_specs=[pl.BlockSpec(memory_space=pl.ANY)],
        out_specs=pl.BlockSpec(memory_space=pl.ANY),
        scratch_shapes=[pltpu.SemaphoreType.DMA],
        cost_estimate=pl.CostEstimate(
            flops=0, transcendentals=0, bytes_accessed=2 * n_bytes
        ),
    )(x)


def identity(x: jax.Array, *, force_kernel: bool = False) -> jax.Array:
    """Identity.forward(x): returns x unchanged (same shape, dtype, values).

    Default path is a zero-cost short-circuit -- no kernel launch, no HBM
    traffic -- which is the fastest correct implementation of Identity.
    `force_kernel=True` routes through the Pallas HBM->HBM DMA kernel and
    always yields a fresh buffer (any shape/dtype), never an alias.
    """
    if not force_kernel:
        return x
    if x.size == 0:
        # Nothing to DMA; jnp.copy still yields a fresh (empty) buffer so the
        # "fresh output" contract of force_kernel holds even for degenerate
        # zero-element inputs.
        return jnp.copy(x)
    return _identity_copy_pallas(x)


if __name__ == "__main__":
    key = jax.random.PRNGKey(0)
    # Small NCHW input consistent with a typical conv-net feature map.
    x = jax.random.normal(key, (2, 4, 16, 16), dtype=jnp.float32)

    # 1) Production path: zero-cost short-circuit.
    y_fast = identity(x)
    jax.block_until_ready(y_fast)
    assert y_fast.shape == x.shape and y_fast.dtype == x.dtype
    assert bool(jnp.all(y_fast == x)), "Identity (short-circuit) mismatch"

    # 2) Pallas HBM->HBM DMA kernel on the small NCHW input.
    y_kernel = identity(x, force_kernel=True)
    jax.block_until_ready(y_kernel)
    assert y_kernel.shape == x.shape and y_kernel.dtype == x.dtype
    assert bool(jnp.all(y_kernel == x)), "Identity (Pallas DMA kernel) mismatch"

    # 3) Ragged shape (element count not a multiple of 128) -- previously fell
    #    back to returning an alias; now copied exactly by the same DMA path.
    x_ragged = jax.random.normal(jax.random.PRNGKey(0), (3, 5, 7), dtype=jnp.float32)
    y_ragged = identity(x_ragged, force_kernel=True)
    jax.block_until_ready(y_ragged)
    assert y_ragged.shape == x_ragged.shape and y_ragged.dtype == x_ragged.dtype
    assert bool(jnp.all(y_ragged == x_ragged)), "Identity (ragged DMA) mismatch"

    # 4) Moderately sized 2-D slab to exercise a larger single-shot DMA.
    x_big = jax.random.normal(jax.random.PRNGKey(0), (4104, 128), dtype=jnp.float32)
    y_big = identity(x_big, force_kernel=True)
    jax.block_until_ready(y_big)
    assert y_big.shape == x_big.shape and y_big.dtype == x_big.dtype
    assert bool(jnp.all(y_big == x_big)), "Identity (large DMA) mismatch"

    print("KERNEL_OK")
</pallas_src>

<mosaic_0001>
module attributes {stable_mosaic.version = 11 : i64} {
  func.func @_identity_dma_kernel(%arg0: memref<2x4x16x16xf32, #tpu.memory_space<any>>, %arg1: memref<2x4x16x16xf32, #tpu.memory_space<any>>, %arg2: memref<!tpu.dma_semaphore, #tpu.memory_space<semaphore_mem>>) attributes {dimension_semantics = [], scalar_prefetch = 0 : i64, scratch_operands = 1 : i64, tpu.core_type = #tpu.core_type<tc>} {
    tpu.enqueue_dma source(%arg0 : memref<2x4x16x16xf32, #tpu.memory_space<any>>) target(%arg1 : memref<2x4x16x16xf32, #tpu.memory_space<any>>) target_semaphore(%arg2 : memref<!tpu.dma_semaphore, #tpu.memory_space<semaphore_mem>>)
    tpu.wait_dma2 semaphore(%arg2 : memref<!tpu.dma_semaphore, #tpu.memory_space<semaphore_mem>>) src(%arg0 : memref<2x4x16x16xf32, #tpu.memory_space<any>>) dst(%arg1 : memref<2x4x16x16xf32, #tpu.memory_space<any>>)
    return
  }
}

</mosaic_0001>

<bundles_post_ra>
// kernel: tpu_custom_call.1
= control target key start
LH: loop header
LB: loop body
LE: loop exit
PB: predicated region body
PF: predicated region fallthrough
CT: control target
= control target key end

     0   :  { %s30_s6 = smov [#allocation2]   ;;  %s31_s7 = smov 131072   ;;  %s49_s0 = inlined_call_operand.hbm [shape: f32[2,4,16,16], index: 0, kind: input, shape index: {}]   ;;  %s50_s1 = inlined_call_operand.hbm [shape: f32[2,4,16,16], index: 1, kind: output, shape index: {}]  }
   0x1   :  { %s32_s8 = smov 0  }
   0x2   :  { %12 = dma.general %s49_s0, 2048, %s50_s1, %s30_s6, %s31_s7, [#allocation4], %s32_s8, 0  }
   0x3   :  { %28 = dma.done.wait [#allocation2], 2048 }
   0x4   :  { %29 = vsyncadd [#allocation2], 4294965248 }
   0x5   :  { %18 = vsyncmov [#allocation2] }
   0x8   :  { %s19_s13 = vpop.sfrf %18 }
   0x9   :  { %p24_p0 = scmp.ne.s32.totalorder %s19_s13, 0 }
   0xb   :  { %23 = shalt.err (%p24_p0)  }

</bundles_post_ra>
